<compile_context>
chip_gen: v5e
topology: v5e:2x2
jax: 0.10.0
libtpu: 0.0.40
codegen_flags: <defaults>
</compile_context>

<pallas_src>
import functools

import jax
import jax.numpy as jnp
from jax.experimental import pallas as pl
from jax.experimental.pallas import tpu as pltpu


def _fm_kernel(x_ref, g_ref, hn_ref, hd_ref, o_ref):
    # x_ref : (tb, N)  input tile (f32 or bf16), N = F*D
    # g_ref : (N, D)   stacked identity (field-sum gather), same dtype as x
    # hn_ref: (N, 8)   0.5 constant (f32)
    # hd_ref: (D, 8)   0.5 constant (f32)
    # o_ref : (tb, 1)  per-row FM term
    x = x_ref[...]

    # Field sum on the MXU: s[j, d] = sum_f x[j, f*D + d]   (exact for 0/1 G)
    s = jnp.dot(x, g_ref[...], preferred_element_type=jnp.float32)   # (tb, D)

    # 0.5 * ||s||^2 per row, reduced over D on the MXU.
    rs = jnp.dot(s * s, hd_ref[...], preferred_element_type=jnp.float32)  # (tb, 8)

    # 0.5 * sum_n x_n^2 per row; square in f32 for accuracy, reduce on the MXU.
    xf = x.astype(jnp.float32)
    rq = jnp.dot(xf * xf, hn_ref[...], preferred_element_type=jnp.float32)  # (tb, 8)

    o_ref[...] = (rs - rq)[:, 0:1]


def _choose_tb(batch, n_lanes, itemsize, embed_dim,
               target_bytes=8 * 1024 * 1024,
               vmem_budget_bytes=20 * 1024 * 1024):
    """Pick the batch-tile size (rows per grid step)."""
    lane_n = pl.cdiv(n_lanes, 128) * 128
    in_row = lane_n * itemsize                      # one lane-padded input row
    f32_row = lane_n * 4                            # in-kernel f32 square temp
    d_row = 2 * embed_dim * 4 + 2 * 8 * 4 + 4       # s, s*s, rq/rs, out per row

    # Target-sized input tile, in whole 128-row groups (clean MXU / store tiling).
    tb = max(128, (target_bytes // in_row) // 128 * 128)

    # Cap so double-buffered input + per-row temps fit the scoped-VMEM budget.
    per_row = 2 * in_row + f32_row + d_row
    cap = max(8, (vmem_budget_bytes // per_row) // 8 * 8)
    tb = min(tb, cap)

    # Keep >= 2 grid steps for reasonably sized batches so the 'parallel' axis
    # can be sharded across TensorCores (v7x megacore); single step otherwise.
    if batch >= 256 and tb >= batch:
        tb = max(128, pl.cdiv(pl.cdiv(batch, 2), 128) * 128)
    return int(tb)


def factorization_machine(x, *, tb=None, reduce_sum=True):
    """x: (B, F, D) -> (B, 1) f32 (reduce_sum=True path of the PyTorch module)."""
    assert reduce_sum, "only reduce_sum=True path implemented in the kernel"
    # TODO(synk): reduce_sum=False path (returns (B, D)) not implemented.

    B, F, D = x.shape
    N = F * D
    x2 = x.reshape(B, N)                         # free metadata reshape
    dt = x2.dtype
    itemsize = jnp.dtype(dt).itemsize

    if tb is None:
        tb = _choose_tb(B, N, itemsize, D)
    tb = int(tb)
    if B <= tb:
        tb = B                                   # single full-array block
    assert tb == B or tb % 8 == 0, "tb must be a multiple of 8 (or == B)"
    nb = pl.cdiv(B, tb)

    # Resident constants (fetched once; index_map is constant across the grid).
    g = jnp.tile(jnp.eye(D, dtype=dt), (F, 1))           # (N, D) field-sum gather
    hn = jnp.full((N, 8), 0.5, dtype=jnp.float32)
    hd = jnp.full((D, 8), 0.5, dtype=jnp.float32)

    out = pl.pallas_call(
        _fm_kernel,
        out_shape=jax.ShapeDtypeStruct((nb * tb, 1), jnp.float32),
        grid_spec=pltpu.PrefetchScalarGridSpec(
            num_scalar_prefetch=0,
            grid=(nb,),
            in_specs=[
                pl.BlockSpec((tb, N), lambda i: (i, 0)),   # x tile (ragged tail OK)
                pl.BlockSpec((N, D), lambda i: (0, 0)),    # G, resident
                pl.BlockSpec((N, 8), lambda i: (0, 0)),    # 0.5 over N, resident
                pl.BlockSpec((D, 8), lambda i: (0, 0)),    # 0.5 over D, resident
            ],
            out_specs=pl.BlockSpec((tb, 1), lambda i: (i, 0)),
        ),
        compiler_params=pltpu.CompilerParams(
            dimension_semantics=("parallel",),
            vmem_limit_bytes=32 * 1024 * 1024,
        ),
        cost_estimate=pl.CostEstimate(
            flops=int(B * (2 * N * D + 4 * N + 2 * D)),
            transcendentals=0,
            bytes_accessed=int(B * N * itemsize + B * 4
                               + N * D * itemsize + (N + D) * 8 * 4),
        ),
    )(x2, g, hn, hd)

    if nb * tb != B:
        out = out[:B]                            # drop garbage ragged-tail rows
    return out


if __name__ == "__main__":
    # Small, deterministic demo shapes: batch=8, fields=4, embed_dim=32.
    key = jax.random.PRNGKey(0)
    B, F, D = 8, 4, 32
    x = jax.random.normal(key, (B, F, D), dtype=jnp.float32)

    out = jax.block_until_ready(factorization_machine(x))
    ref = 0.5 * jnp.sum(
        jnp.sum(x, axis=1) ** 2 - jnp.sum(x ** 2, axis=1),
        axis=1, keepdims=True)
    assert out.shape == (B, 1)
    assert jnp.allclose(out, ref, atol=1e-4, rtol=1e-4)

    # bf16 input + batch not a multiple of 8: exercises the full-array block
    # path (no padding) and the bf16 MXU field-sum / f32 square path.
    B2 = 10
    x_bf16 = jax.random.normal(jax.random.PRNGKey(1), (B2, F, D),
                               dtype=jnp.bfloat16)
    out2 = jax.block_until_ready(factorization_machine(x_bf16))
    xf = x_bf16.astype(jnp.float32)
    ref2 = 0.5 * jnp.sum(
        jnp.sum(xf, axis=1) ** 2 - jnp.sum(xf ** 2, axis=1),
        axis=1, keepdims=True)
    assert out2.shape == (B2, 1)
    assert jnp.allclose(out2, ref2, atol=1e-2, rtol=1e-2)

    # Multi-step grid with a ragged last block (B % tb != 0, no jnp.pad):
    # verifies the padding-free boundary handling the review asked about.
    B3 = 300
    x3 = jax.random.normal(jax.random.PRNGKey(2), (B3, F, D), dtype=jnp.float32)
    out3 = jax.block_until_ready(factorization_machine(x3, tb=128))
    ref3 = 0.5 * jnp.sum(
        jnp.sum(x3, axis=1) ** 2 - jnp.sum(x3 ** 2, axis=1),
        axis=1, keepdims=True)
    assert out3.shape == (B3, 1)
    assert jnp.allclose(out3, ref3, atol=1e-4, rtol=1e-4)

    print("KERNEL_OK")
</pallas_src>

<mosaic_0001>
module attributes {stable_mosaic.version = 11 : i64} {
  func.func @_fm_kernel(%arg0: i32, %arg1: memref<8x128xf32, #tpu.memory_space<vmem>>, %arg2: memref<128x32xf32, #tpu.memory_space<vmem>>, %arg3: memref<128x8xf32, #tpu.memory_space<vmem>>, %arg4: memref<32x8xf32, #tpu.memory_space<vmem>>, %arg5: memref<8x1xf32, #tpu.memory_space<vmem>>) attributes {dimension_semantics = [#tpu.dimension_semantics<parallel>], iteration_bounds = array<i64: 1>, scalar_prefetch = 0 : i64, scratch_operands = 0 : i64, tpu.core_type = #tpu.core_type<tc>, window_params = [{transform_indices = @transform_0, window_bounds = array<i64: 8, 128>}, {pipeline_mode = #tpu.pipeline_mode<synchronous>, transform_indices = @transform_1, window_bounds = array<i64: 128, 32>}, {pipeline_mode = #tpu.pipeline_mode<synchronous>, transform_indices = @transform_2, window_bounds = array<i64: 128, 8>}, {pipeline_mode = #tpu.pipeline_mode<synchronous>, transform_indices = @transform_3, window_bounds = array<i64: 32, 8>}, {transform_indices = @transform_4, window_bounds = array<i64: 8, 1>}]} {
    %c0 = arith.constant 0 : index
    %c0_0 = arith.constant 0 : index
    %0 = vector.load %arg1[%c0, %c0_0] : memref<8x128xf32, #tpu.memory_space<vmem>>, vector<8x128xf32>
    %c0_1 = arith.constant 0 : index
    %c0_2 = arith.constant 0 : index
    %1 = vector.load %arg2[%c0_1, %c0_2] : memref<128x32xf32, #tpu.memory_space<vmem>>, vector<128x32xf32>
    %cst = arith.constant dense<0.000000e+00> : vector<8x32xf32>
    %2 = tpu.matmul %0, %1, %cst {dimension_numbers = #tpu.dot_dimension_numbers<[1], [0], [0], [1], [0, 0, 1, 1], [], []>} : vector<8x128xf32>, vector<128x32xf32>, vector<8x32xf32> -> vector<8x32xf32>
    %3 = arith.mulf %2, %2 : vector<8x32xf32>
    %c0_3 = arith.constant 0 : index
    %c0_4 = arith.constant 0 : index
    %4 = vector.load %arg4[%c0_3, %c0_4] : memref<32x8xf32, #tpu.memory_space<vmem>>, vector<32x8xf32>
    %cst_5 = arith.constant dense<0.000000e+00> : vector<8x8xf32>
    %5 = tpu.matmul %3, %4, %cst_5 {dimension_numbers = #tpu.dot_dimension_numbers<[1], [0], [0], [1], [0, 0, 1, 1], [], []>} : vector<8x32xf32>, vector<32x8xf32>, vector<8x8xf32> -> vector<8x8xf32>
    %6 = arith.mulf %0, %0 : vector<8x128xf32>
    %c0_6 = arith.constant 0 : index
    %c0_7 = arith.constant 0 : index
    %7 = vector.load %arg3[%c0_6, %c0_7] : memref<128x8xf32, #tpu.memory_space<vmem>>, vector<128x8xf32>
    %cst_8 = arith.constant dense<0.000000e+00> : vector<8x8xf32>
    %8 = tpu.matmul %6, %7, %cst_8 {dimension_numbers = #tpu.dot_dimension_numbers<[1], [0], [0], [1], [0, 0, 1, 1], [], []>} : vector<8x128xf32>, vector<128x8xf32>, vector<8x8xf32> -> vector<8x8xf32>
    %9 = arith.subf %5, %8 : vector<8x8xf32>
    %10 = vector.extract_strided_slice %9 {offsets = [0, 0], sizes = [8, 1], strides = [1, 1]} : vector<8x8xf32> to vector<8x1xf32>
    %c0_9 = arith.constant 0 : index
    %c0_10 = arith.constant 0 : index
    %11 = vector.load %arg5[%c0_9, %c0_10] : memref<8x1xf32, #tpu.memory_space<vmem>>, vector<8x1xf32>
    tpu.vector_store %arg5[%c0_9, %c0_10], %10 {strides = array<i32>} : memref<8x1xf32, #tpu.memory_space<vmem>>, vector<8x1xf32>,
    return
  }
  func.func @transform_0(%arg0: i32) -> (i32, i32) {
    %c0_i32 = arith.constant 0 : i32
    %c0_i32_0 = arith.constant 0 : i32
    return %arg0, %c0_i32 : i32, i32
  }
  func.func @transform_1(%arg0: i32) -> (i32, i32) {
    %c0_i32 = arith.constant 0 : i32
    %c0_i32_0 = arith.constant 0 : i32
    %c0_i32_1 = arith.constant 0 : i32
    return %c0_i32, %c0_i32_0 : i32, i32
  }
  func.func @transform_2(%arg0: i32) -> (i32, i32) {
    %c0_i32 = arith.constant 0 : i32
    %c0_i32_0 = arith.constant 0 : i32
    %c0_i32_1 = arith.constant 0 : i32
    return %c0_i32, %c0_i32_0 : i32, i32
  }
  func.func @transform_3(%arg0: i32) -> (i32, i32) {
    %c0_i32 = arith.constant 0 : i32
    %c0_i32_0 = arith.constant 0 : i32
    %c0_i32_1 = arith.constant 0 : i32
    return %c0_i32, %c0_i32_0 : i32, i32
  }
  func.func @transform_4(%arg0: i32) -> (i32, i32) {
    %c0_i32 = arith.constant 0 : i32
    %c0_i32_0 = arith.constant 0 : i32
    return %arg0, %c0_i32 : i32, i32
  }
}

</mosaic_0001>

<bundles_post_ra>
// kernel: tpu_custom_call.1
= control target key start
LH: loop header
LB: loop body
LE: loop exit
PB: predicated region body
PF: predicated region fallthrough
CT: control target
= control target key end

     0   :  { %vm59_vm0 = vcmask 261120   ;;  %vm121_vm1 = vcmask 7168   ;;  %s267_s1 = inlined_call_operand.vmem [shape: f32[128,32], index: 1, kind: input, shape index: {}]   ;;  %s268_s2 = inlined_call_operand.vmem [shape: f32[128,8], index: 2, kind: input, shape index: {}]   ;;  %s269_s3 = inlined_call_operand.vmem [shape: f32[32,8], index: 3, kind: input, shape index: {}]   ;;  %s270_s0 = inlined_call_operand.vmem [shape: f32[8,128], index: 0, kind: input, shape index: {}]   ;;  %s271_s4 = inlined_call_operand.vmem [shape: f32[8,1], index: 4, kind: output, shape index: {}]  }
   0x1   :  { %v33_v0 = vld [vmem:[%s267_s1 + $0x78] sm:$0xff]  ;;  %v32_v1 = vld [vmem:[%s267_s1 + $0x70] sm:$0xff]  ;;  %v31_v2 = vld [vmem:[%s267_s1 + $0x68] sm:$0xff] }
   0x2   :  { %34 = vmatpush.msra.mxu0 %v33_v0  ;;  %v30_v3 = vld [vmem:[%s267_s1 + $0x60] sm:$0xff]  ;;  %v99_v4 = vld [vmem:[%s268_s2 + $0x78] sm:$0xff]  ;;  %v98_v6 = vld [vmem:[%s268_s2 + $0x70] sm:$0xff] }
   0x3   :  { %v29_v5 = vld [vmem:[%s267_s1 + $0x58] sm:$0xff]  ;;  %100 = vmatpush.msra.mxu2 %v99_v4  ;;  %v97_v7 = vld [vmem:[%s268_s2 + $0x68] sm:$0xff]  ;;  %v28_v8 = vld [vmem:[%s267_s1 + $0x50] sm:$0xff] }
   0x4   :  { %35 = vmatpush.msra.mxu0 %v32_v1  ;;  %v96_v9 = vld [vmem:[%s268_s2 + $0x60] sm:$0xff]  ;;  %v27_v10 = vld [vmem:[%s267_s1 + $0x48] sm:$0xff]  ;;  %v58_v11 = vld [vmem:[%s269_s3 + $0x18] sm:$0xff] }
   0x5   :  { %101 = vmatpush.msra.mxu2 %v98_v6  ;;  %v95_v12 = vld [vmem:[%s268_s2 + $0x58] sm:$0xff]  ;;  %75 = vmatpush.msra.mxu1 %v58_v11  ;;  %v57_v13 = vld [vmem:[%s269_s3 + $0x10] sm:$0xff]  ;;  %v26_v14 = vld [vmem:[%s267_s1 + $0x40] sm:$0xff] }
   0x6   :  { %36 = vmatpush.msra.mxu0 %v31_v2  ;;  %v94_v15 = vld [vmem:[%s268_s2 + $0x50] sm:$0xff]  ;;  %v25_v16 = vld [vmem:[%s267_s1 + $0x38] sm:$0xff]  ;;  %v93_v17 = vld [vmem:[%s268_s2 + $0x48] sm:$0xff] }
   0x7   :  { %102 = vmatpush.msra.mxu2 %v97_v7  ;;  %76 = vmatpush.msra.mxu1 %v57_v13  ;;  %v24_v18 = vld [vmem:[%s267_s1 + $0x30] sm:$0xff]  ;;  %v92_v19 = vld [vmem:[%s268_s2 + $0x40] sm:$0xff]  ;;  %v23_v20 = vld [vmem:[%s267_s1 + $0x28] sm:$0xff] }
   0x8   :  { %37 = vmatpush.msra.mxu0 %v30_v3  ;;  %v91_v21 = vld [vmem:[%s268_s2 + $0x38] sm:$0xff]  ;;  %v22_v22 = vld [vmem:[%s267_s1 + $0x20] sm:$0xff]  ;;  %v90_v23 = vld [vmem:[%s268_s2 + $0x30] sm:$0xff] }
   0x9   :  { %103 = vmatpush.msra.mxu2 %v96_v9  ;;  %v21_v24 = vld [vmem:[%s267_s1 + $0x18] sm:$0xff]  ;;  %v89_v25 = vld [vmem:[%s268_s2 + $0x28] sm:$0xff]  ;;  %v20_v26 = vld [vmem:[%s267_s1 + $0x10] sm:$0xff] }
   0xa   :  { %38 = vmatpush.msra.mxu0 %v29_v5  ;;  %v88_v27 = vld [vmem:[%s268_s2 + $0x20] sm:$0xff]  ;;  %v19_v28 = vld [vmem:[%s267_s1 + $0x8] sm:$0xff]  ;;  %v87_v29 = vld [vmem:[%s268_s2 + $0x18] sm:$0xff] }
   0xb   :  { %104 = vmatpush.msra.mxu2 %v95_v12  ;;  %v18_v30 = vld [vmem:[%s267_s1] sm:$0xff]  ;;  %v86_v32 = vld [vmem:[%s268_s2 + $0x10] sm:$0xff]  ;;  %v85_v33 = vld [vmem:[%s268_s2 + $0x8] sm:$0xff] }
   0xc   :  { %39 = vmatpush.msra.mxu0 %v28_v8  ;;  %v17_v31 = vld [vmem:[%s270_s0] sm:$0xff]  ;;  %v56_v36 = vld [vmem:[%s269_s3 + $0x8] sm:$0xff] }
   0xd   :  { %105 = vmatpush.msra.mxu2 %v94_v15  ;;  %v84_v34 = vld [vmem:[%s268_s2] sm:$0xff]  ;;  %v83_v35 = vmul.f32 %v17_v31, %v17_v31  ;;  %77 = vmatpush.msra.mxu1 %v56_v36 }
   0xe   :  { %40 = vmatpush.msra.mxu0 %v27_v10  ;;  %v55_v37 = vld [vmem:[%s269_s3] sm:$0xff] }
   0xf   :  { %106 = vmatpush.msra.mxu2 %v93_v17  ;;  %78 = vmatpush.msra.mxu1 %v55_v37 }
  0x10   :  { %41 = vmatpush.msra.mxu0 %v26_v14 }
  0x11   :  { %107 = vmatpush.msra.mxu2 %v92_v19 }
  0x12   :  { %42 = vmatpush.msra.mxu0 %v25_v16 }
  0x13   :  { %108 = vmatpush.msra.mxu2 %v91_v21 }
  0x14   :  { %43 = vmatpush.msra.mxu0 %v24_v18 }
  0x15   :  { %109 = vmatpush.msra.mxu2 %v90_v23 }
  0x16   :  { %44 = vmatpush.msra.mxu0 %v23_v20 }
  0x17   :  { %110 = vmatpush.msra.mxu2 %v89_v25 }
  0x18   :  { %45 = vmatpush.msra.mxu0 %v22_v22 }
  0x19   :  { %111 = vmatpush.msra.mxu2 %v88_v27 }
  0x1a   :  { %46 = vmatpush.msra.mxu0 %v21_v24 }
  0x1b   :  { %112 = vmatpush.msra.mxu2 %v87_v29 }
  0x1c   :  { %47 = vmatpush.msra.mxu0 %v20_v26 }
  0x1d   :  { %113 = vmatpush.msra.mxu2 %v86_v32 }
  0x1e   :  { %48 = vmatpush.msra.mxu0 %v19_v28 }
  0x1f   :  { %114 = vmatpush.msra.mxu2 %v85_v33 }
  0x20   :  { %49 = vmatpush.msra.mxu0 %v18_v30 }
  0x21   :  { %50 = vmatmul.f32.vlgmr.msra.gmra.mxu0 %v17_v31  ;;  %115 = vmatpush.msra.mxu2 %v84_v34 }
  0x22   :  { %116 = vmatmul.f32.vlgmr.msra.gmra.mxu2 %v83_v35 }
  0x9e   :  { %v51_v38 = vpop.f32.mrf.mxu0 }
  0x9f   :  { %v54_v39 = vmul.f32 %v51_v38, %v51_v38 }
  0xa1   :  { %127 = vmatmul.msk.f32.vlgmr.msra.gmra.mxu1 %vm59_vm0, %v54_v39 }
  0xa5   :  { %v117_v40 = vpop.f32.mrf.mxu2 }
 0x11e   :  { %v80_v41 = vpop.f32.mrf.mxu1 }
 0x11f   :  { %v120_v42 = vsub.f32 %v80_v41, %v117_v40 }
 0x121   :  { %122 = vst.msk [vmem:[%s271_s4] sm:$0xff] %vm121_vm1, %v120_v42 }

</bundles_post_ra>
